<compile_context>
chip_gen: v6e
topology: v6e:2x2x1
jax: 0.10.0
libtpu: 0.0.40
codegen_flags: <defaults>
</compile_context>

<pallas_src>
import functools

import jax
import jax.numpy as jnp
from jax.experimental import pallas as pl
from jax.experimental.pallas import tpu as pltpu

BN_EPS = 1e-5
LANE = 128        # f32 lane width
SUBLANE = 8       # f32 sublane width
ROW_ALIGN = 16    # batch-tile alignment (bf16 native sublane tiling)


def _round_up(x, n):
    return ((x + n - 1) // n) * n


def _cdiv(a, b):
    return (a + b - 1) // b


def _vmem_capacity_bytes():
    """Generation-aware VMEM capacity (v5e/v6e: 128 MiB, v7x: 64 MiB/TC)."""
    try:
        return int(pltpu.get_tpu_info().vmem_capacity_bytes)
    except Exception:
        return 64 << 20   # conservative fallback (v7x)


def _pad2(a, rows, cols):
    return jnp.pad(a, ((0, rows - a.shape[0]), (0, cols - a.shape[1])))


def _pad1(a, n):
    return jnp.pad(a, ((0, n - a.shape[0]),))


# ---------------------------------------------------------------------------
# Fused path: whole encoder in one VMEM-resident pallas_call
# ---------------------------------------------------------------------------
def _fused_kernel(x_ref, w1_ref, w2_ref, w3_ref, w4_ref, bp_ref, o_ref,
                  *, dims_p, b_actual, b_pad):
    """x_ref:(b_pad,d_p) f32, w*_ref:(n_in,n_out) bf16, bp_ref:(16,n_max) f32
    packed [b1..b4, g1..g3, be1..be3, 0-pad], o_ref:(b_pad,n4) f32."""
    n1, n2, n3, n4 = dims_p[1:]
    needs_mask = b_pad != b_actual
    if needs_mask:
        rows = jax.lax.broadcasted_iota(jnp.int32, (b_pad, 1), 0)
        valid = rows < b_actual
    inv_n = jnp.float32(1.0 / b_actual)

    def linear(h, w_ref, bias_row, n):
        # bf16-fed MXU matmul with f32 accumulation; padded rows/cols are zero.
        return (jnp.dot(h.astype(jnp.bfloat16), w_ref[...],
                        preferred_element_type=jnp.float32)
                + bp_ref[bias_row:bias_row + 1, :n])

    def bn_relu(h, gamma_row, beta_row, n):
        # Two-pass batch statistics (mean, then var of the centered values):
        # sublane reductions land on the VPU/XLU, keeping the MXU free.
        gamma = bp_ref[gamma_row:gamma_row + 1, :n]
        beta = bp_ref[beta_row:beta_row + 1, :n]
        hm = jnp.where(valid, h, 0.0) if needs_mask else h
        mean = jnp.sum(hm, axis=0, keepdims=True) * inv_n
        cen = h - mean
        cm = jnp.where(valid, cen, 0.0) if needs_mask else cen
        var = jnp.sum(cm * cm, axis=0, keepdims=True) * inv_n
        scale = gamma * jax.lax.rsqrt(var + BN_EPS)
        return jnp.maximum(cen * scale + beta, 0.0)

    h = bn_relu(linear(x_ref[...], w1_ref, 0, n1), 4, 7, n1)
    h = bn_relu(linear(h, w2_ref, 1, n2), 5, 8, n2)
    h = bn_relu(linear(h, w3_ref, 2, n3), 6, 9, n3)
    o_ref[...] = linear(h, w4_ref, 3, n4)


def _fused_forward(x, params, dims, dims_p, cap, est_bytes):
    (w1, b1, g1, be1, w2, b2, g2, be2, w3, b3, g3, be3, w4, b4) = params
    b = x.shape[0]
    b_pad = _round_up(b, SUBLANE)
    n_max = max(dims_p[1:])

    ws = [_pad2(w, dims_p[i], dims_p[i + 1]).astype(jnp.bfloat16)
          for i, w in enumerate((w1, w2, w3, w4))]

    def row(v):
        return _pad1(v.astype(jnp.float32), n_max)

    # Pack biases + BN params into one small lane-aligned slab (rows 0..9).
    bp = jnp.stack([row(b1), row(b2), row(b3), row(b4),
                    row(g1), row(g2), row(g3),
                    row(be1), row(be2), row(be3)], axis=0)
    bp = jnp.pad(bp, ((0, 16 - bp.shape[0]), (0, 0)))

    x_p = _pad2(x.astype(jnp.float32), b_pad, dims_p[0])

    vmem_limit = int(min(0.9 * cap, max(2 * est_bytes, 32 << 20)))
    kernel = functools.partial(_fused_kernel, dims_p=dims_p,
                               b_actual=b, b_pad=b_pad)
    y = pl.pallas_call(
        kernel,
        out_shape=jax.ShapeDtypeStruct((b_pad, dims_p[4]), jnp.float32),
        compiler_params=pltpu.CompilerParams(vmem_limit_bytes=vmem_limit),
    )(x_p, ws[0], ws[1], ws[2], ws[3], bp)
    return y[:b, :dims[4]]


# ---------------------------------------------------------------------------
# Staged fallback: one fused stage per pallas_call, batch tiled over a grid
#   [BN scale/shift + ReLU] -> Linear -> [per-tile batch sum / sum-of-squares]
# ---------------------------------------------------------------------------
def _stage_kernel(x_ref, st_ref, w_ref, b_ref, y_ref, *stats_refs,
                  tb, b_actual, apply_bn_relu, mask_mode):
    """x_ref:(tb,n_in) f32/bf16, st_ref:(2,n_in) f32 [scale;shift],
    w_ref:(n_in,n_out) bf16, b_ref:(1,n_out) f32, y_ref:(tb,n_out),
    optional stats_ref:(1,8,n_out) f32 (rows 0/1 = sum / sum-of-squares)."""
    i = pl.program_id(0)

    x = x_ref[...].astype(jnp.float32)
    if apply_bn_relu:
        x = jnp.maximum(x * st_ref[0:1, :] + st_ref[1:2, :], 0.0)

    # bf16-fed MXU matmul, f32 accumulation; bias broadcast over batch.
    y = jnp.dot(x.astype(jnp.bfloat16), w_ref[...],
                preferred_element_type=jnp.float32) + b_ref[...]
    y_ref[...] = y.astype(y_ref.dtype)   # bf16 store for intermediate stages

    if stats_refs:
        (stats_ref,) = stats_refs

        def mask_rows(v):
            rows = jax.lax.broadcasted_iota(jnp.int32, (tb, 1), 0)
            return jnp.where(rows + i * tb < b_actual, v, 0.0)

        def write(v):
            # VPU/XLU sublane reductions (no MXU selector matmuls).
            stats_ref[0, 0:1, :] = jnp.sum(v, axis=0, keepdims=True)
            stats_ref[0, 1:2, :] = jnp.sum(v * v, axis=0, keepdims=True)

        if mask_mode == 0:        # batch is an exact multiple of the tile
            write(y)
        elif mask_mode == 1:      # padded rows live only in the last tile
            last = pl.num_programs(0) - 1

            @pl.when(i == last)
            def _():
                write(mask_rows(y))

            @pl.when(i != last)
            def _():
                write(y)
        else:                     # rare fallback: mask every tile
            write(mask_rows(y))


def _stage_call(x_p, st, w, bias, *, tb, b_actual, apply_bn_relu, emit_stats,
                out_dtype, mask_mode, vmem_limit):
    b_pad, n_in = x_p.shape
    n_out = w.shape[1]
    num_tiles = b_pad // tb

    kernel = functools.partial(_stage_kernel, tb=tb, b_actual=b_actual,
                               apply_bn_relu=apply_bn_relu, mask_mode=mask_mode)

    in_specs = [
        pl.BlockSpec((tb, n_in), lambda i: (i, 0)),        # activation tile
        pl.BlockSpec((2, n_in), lambda i: (0, 0)),         # BN scale/shift (resident)
        pl.BlockSpec((n_in, n_out), lambda i: (0, 0)),     # bf16 weight (resident)
        pl.BlockSpec((1, n_out), lambda i: (0, 0)),        # bias (resident)
    ]
    out_shape = [jax.ShapeDtypeStruct((b_pad, n_out), out_dtype)]
    out_specs = [pl.BlockSpec((tb, n_out), lambda i: (i, 0))]
    if emit_stats:
        out_shape.append(
            jax.ShapeDtypeStruct((num_tiles, SUBLANE, n_out), jnp.float32))
        out_specs.append(pl.BlockSpec((1, SUBLANE, n_out), lambda i: (i, 0, 0)))

    outs = pl.pallas_call(
        kernel,
        grid=(num_tiles,),
        in_specs=in_specs,
        out_specs=out_specs,
        out_shape=out_shape,
        compiler_params=pltpu.CompilerParams(
            dimension_semantics=("parallel",),   # shard batch over v7x's 2 TCs
            vmem_limit_bytes=vmem_limit),
    )(x_p, st, w, bias)

    if emit_stats:
        return outs[0], outs[1]
    return outs[0], None


def _bn_scale_shift(stats, gamma_p, beta_p, n_valid):
    """Reduce per-tile partials -> global mean/var -> fused scale/shift."""
    ssum = jnp.sum(stats[:, 0, :], axis=0)
    ssq = jnp.sum(stats[:, 1, :], axis=0)
    mean = ssum / n_valid
    var = jnp.maximum(ssq / n_valid - mean * mean, 0.0)   # biased (train) var
    scale = gamma_p * jax.lax.rsqrt(var + BN_EPS)
    shift = beta_p - mean * scale
    return jnp.stack([scale, shift], axis=0)              # (2, n_pad)


def _staged_batch_tiling(b, dims_p, budget_bytes):
    """Pick the largest batch tile whose double-buffered activations + bf16
    weight slab fit the budget, then derive tb from the tile count so the
    total padding is always < one tile."""
    max_pair = max(dims_p[i] + dims_p[i + 1] for i in range(len(dims_p) - 1))
    max_w = max(dims_p[i] * dims_p[i + 1] for i in range(len(dims_p) - 1))
    tb_cap = 1024
    while tb_cap > ROW_ALIGN and (2 * tb_cap * max_pair * 4 + 4 * max_w) > budget_bytes:
        tb_cap //= 2
    tb_cap = max(ROW_ALIGN, tb_cap)
    b_al = _round_up(b, ROW_ALIGN)
    num_tiles = _cdiv(b_al, tb_cap)
    tb = _round_up(_cdiv(b, num_tiles), ROW_ALIGN)
    return tb, tb * num_tiles, num_tiles


def _staged_forward(x, params, dims, dims_p, cap):
    (w1, b1, g1, be1, w2, b2, g2, be2, w3, b3, g3, be3, w4, b4) = params
    b = x.shape[0]

    budget = int(0.55 * cap)       # ~70 MiB on 128 MiB parts, ~35 MiB on v7x
    tb, b_pad, num_tiles = _staged_batch_tiling(b, dims_p, budget)

    if b_pad == b:
        mask_mode = 0
    elif b > (num_tiles - 1) * tb:   # padding confined to the last tile
        mask_mode = 1
    else:
        mask_mode = 2

    max_pair = max(dims_p[i] + dims_p[i + 1] for i in range(4))
    max_w = max(dims_p[i] * dims_p[i + 1] for i in range(4))
    need = 2 * tb * max_pair * 4 + 4 * max_w + (1 << 20)
    vmem_limit = int(min(0.9 * cap, max(1.5 * need, 32 << 20)))
    # TODO(synk): for very wide layers where a single bf16 weight slab dominates
    # VMEM, tile n_out with a second grid axis instead of shrinking tb.

    ws = [_pad2(w, dims_p[i], dims_p[i + 1]).astype(jnp.bfloat16)
          for i, w in enumerate((w1, w2, w3, w4))]
    bs = [_pad1(v, dims_p[i + 1]).reshape(1, dims_p[i + 1]).astype(jnp.float32)
          for i, v in enumerate((b1, b2, b3, b4))]
    gs = [_pad1(v, dims_p[i + 1]).astype(jnp.float32)
          for i, v in enumerate((g1, g2, g3))]
    bes = [_pad1(v, dims_p[i + 1]).astype(jnp.float32)
           for i, v in enumerate((be1, be2, be3))]

    x_p = _pad2(x.astype(jnp.float32), b_pad, dims_p[0])
    st_id = jnp.zeros((2, dims_p[0]), jnp.float32)     # unused by stage 1

    common = dict(tb=tb, b_actual=b, mask_mode=mask_mode, vmem_limit=vmem_limit)

    y1, s1 = _stage_call(x_p, st_id, ws[0], bs[0], apply_bn_relu=False,
                         emit_stats=True, out_dtype=jnp.bfloat16, **common)
    st1 = _bn_scale_shift(s1, gs[0], bes[0], b)
    y2, s2 = _stage_call(y1, st1, ws[1], bs[1], apply_bn_relu=True,
                         emit_stats=True, out_dtype=jnp.bfloat16, **common)
    st2 = _bn_scale_shift(s2, gs[1], bes[1], b)
    y3, s3 = _stage_call(y2, st2, ws[2], bs[2], apply_bn_relu=True,
                         emit_stats=True, out_dtype=jnp.bfloat16, **common)
    st3 = _bn_scale_shift(s3, gs[2], bes[2], b)
    y4, _ = _stage_call(y3, st3, ws[3], bs[3], apply_bn_relu=True,
                        emit_stats=False, out_dtype=jnp.float32, **common)
    return y4[:b, :dims[4]]


# ---------------------------------------------------------------------------
# Public entry point
# ---------------------------------------------------------------------------
@functools.partial(jax.jit, static_argnames=("force_staged",))
def encoder_forward(x, params, force_staged=False):
    """params = (w1,b1,g1,be1, w2,b2,g2,be2, w3,b3,g3,be3, w4,b4);
    weights stored (in, out) so y = x @ W + b (== PyTorch x @ W.T + b)."""
    b, d = x.shape
    dims = (d, params[0].shape[1], params[4].shape[1],
            params[8].shape[1], params[12].shape[1])
    dims_p = tuple(_round_up(v, LANE) for v in dims)
    cap = _vmem_capacity_bytes()

    # If the whole (padded) activation slab + all bf16 weights comfortably fit
    # VMEM, run the fully fused single-launch kernel; otherwise tile the batch.
    b_pad_f = _round_up(b, SUBLANE)
    est = (4 * b_pad_f * (sum(dims_p) + 2 * max(dims_p))
           + 2 * sum(dims_p[i] * dims_p[i + 1] for i in range(4)) + (1 << 20))
    if (not force_staged) and est <= cap // 2:
        return _fused_forward(x, params, dims, dims_p, cap, est)
    return _staged_forward(x, params, dims, dims_p, cap)


# ---------------------------------------------------------------------------
# Parameter init (matches Encoder._init_weights + BatchNorm defaults)
# ---------------------------------------------------------------------------
def init_encoder_params(key, d, m, c):
    dims = [d, 2 * m, m, m // 2, c]
    keys = jax.random.split(key, 4)
    params = []
    for i in range(4):
        fan_in, fan_out = dims[i], dims[i + 1]
        w = jax.random.normal(keys[i], (fan_in, fan_out), jnp.float32) / jnp.sqrt(
            jnp.float32(fan_in))
        params += [w, jnp.zeros((fan_out,), jnp.float32)]
        if i < 3:  # BatchNorm1d after the first three Linear layers
            params += [jnp.ones((fan_out,), jnp.float32),
                       jnp.zeros((fan_out,), jnp.float32)]
    return tuple(params)


def _reference_forward(x, params):
    """Pure-JAX reference with matching bf16-fed matmul precision."""
    (w1, b1, g1, be1, w2, b2, g2, be2, w3, b3, g3, be3, w4, b4) = params

    def lin(h, w, b):
        return jnp.dot(h.astype(jnp.bfloat16), w.astype(jnp.bfloat16),
                       preferred_element_type=jnp.float32) + b

    def bn_relu(h, g, be):
        mean = jnp.mean(h, axis=0, keepdims=True)
        var = jnp.mean((h - mean) ** 2, axis=0, keepdims=True)
        return jnp.maximum((h - mean) * jax.lax.rsqrt(var + BN_EPS) * g + be, 0.0)

    h = bn_relu(lin(x, w1, b1), g1, be1)
    h = bn_relu(lin(h, w2, b2), g2, be2)
    h = bn_relu(lin(h, w3, b3), g3, be3)
    return lin(h, w4, b4)


if __name__ == "__main__":
    # Small shapes consistent with the module: x is (b, d), output is (b, c).
    b, d, m, c = 8, 32, 32, 8

    key = jax.random.PRNGKey(0)
    k_x, k_p = jax.random.split(key)
    x = jax.random.normal(k_x, (b, d), jnp.float32)
    params = init_encoder_params(k_p, d, m, c)

    ref = _reference_forward(x, params)

    # Primary path: fully fused single pallas_call (used at these shapes).
    out = jax.block_until_ready(encoder_forward(x, params))
    assert out.shape == (b, c), out.shape
    err = float(jnp.max(jnp.abs(out - ref)))
    assert jnp.allclose(out, ref, atol=1e-2, rtol=1e-2), f"fused max abs err {err}"

    # Also exercise the batch-tiled staged fallback (bf16 intermediates, hence
    # a slightly looser tolerance).
    out2 = jax.block_until_ready(encoder_forward(x, params, force_staged=True))
    assert out2.shape == (b, c), out2.shape
    err2 = float(jnp.max(jnp.abs(out2 - ref)))
    assert jnp.allclose(out2, ref, atol=2e-2, rtol=2e-2), f"staged max abs err {err2}"

    print("KERNEL_OK")
</pallas_src>

<mosaic_0001>
module attributes {stable_mosaic.version = 11 : i64} {
  func.func @_fused_kernel(%arg0: memref<8x128xf32, #tpu.memory_space<vmem>>, %arg1: memref<128x128xbf16, #tpu.memory_space<vmem>>, %arg2: memref<128x128xbf16, #tpu.memory_space<vmem>>, %arg3: memref<128x128xbf16, #tpu.memory_space<vmem>>, %arg4: memref<128x128xbf16, #tpu.memory_space<vmem>>, %arg5: memref<16x128xf32, #tpu.memory_space<vmem>>, %arg6: memref<8x128xf32, #tpu.memory_space<vmem>>) attributes {dimension_semantics = [], scalar_prefetch = 0 : i64, scratch_operands = 0 : i64, tpu.core_type = #tpu.core_type<tc>} {
    %c0 = arith.constant 0 : index
    %c0_0 = arith.constant 0 : index
    %0 = vector.load %arg0[%c0, %c0_0] : memref<8x128xf32, #tpu.memory_space<vmem>>, vector<8x128xf32>
    %1 = arith.truncf %0 : vector<8x128xf32> to vector<8x128xbf16>
    %c0_1 = arith.constant 0 : index
    %c0_2 = arith.constant 0 : index
    %2 = vector.load %arg1[%c0_1, %c0_2] : memref<128x128xbf16, #tpu.memory_space<vmem>>, vector<128x128xbf16>
    %cst = arith.constant dense<0.000000e+00> : vector<8x128xf32>
    %3 = tpu.matmul %1, %2, %cst {dimension_numbers = #tpu.dot_dimension_numbers<[1], [0], [0], [1], [0, 0, 1, 1], [], []>} : vector<8x128xbf16>, vector<128x128xbf16>, vector<8x128xf32> -> vector<8x128xf32>
    %c0_3 = arith.constant 0 : index
    %c0_4 = arith.constant 0 : index
    %4 = vector.load %arg5[%c0_3, %c0_4] : memref<16x128xf32, #tpu.memory_space<vmem>>, vector<1x128xf32>
    %5 = vector.broadcast %4 : vector<1x128xf32> to vector<8x128xf32>
    %6 = arith.addf %3, %5 : vector<8x128xf32>
    %c4 = arith.constant 4 : index
    %c0_5 = arith.constant 0 : index
    %7 = vector.load %arg5[%c4, %c0_5] : memref<16x128xf32, #tpu.memory_space<vmem>>, vector<1x128xf32>
    %c7 = arith.constant 7 : index
    %c0_6 = arith.constant 0 : index
    %8 = vector.load %arg5[%c7, %c0_6] : memref<16x128xf32, #tpu.memory_space<vmem>>, vector<1x128xf32>
    %cst_7 = arith.constant dense<0.000000e+00> : vector<128xf32>
    %9 = vector.multi_reduction <add>, %6, %cst_7 [0] : vector<8x128xf32> to vector<128xf32>
    %10 = vector.shape_cast %9 : vector<128xf32> to vector<1x128xf32>
    %cst_8 = arith.constant 1.250000e-01 : f32
    %11 = vector.broadcast %cst_8 : f32 to vector<1x128xf32>
    %12 = arith.mulf %10, %11 : vector<1x128xf32>
    %13 = vector.broadcast %12 : vector<1x128xf32> to vector<8x128xf32>
    %14 = arith.subf %6, %13 : vector<8x128xf32>
    %15 = arith.mulf %14, %14 : vector<8x128xf32>
    %cst_9 = arith.constant dense<0.000000e+00> : vector<128xf32>
    %16 = vector.multi_reduction <add>, %15, %cst_9 [0] : vector<8x128xf32> to vector<128xf32>
    %17 = vector.shape_cast %16 : vector<128xf32> to vector<1x128xf32>
    %cst_10 = arith.constant 1.250000e-01 : f32
    %18 = vector.broadcast %cst_10 : f32 to vector<1x128xf32>
    %19 = arith.mulf %17, %18 : vector<1x128xf32>
    %cst_11 = arith.constant 9.99999974E-6 : f32
    %20 = vector.broadcast %cst_11 : f32 to vector<1x128xf32>
    %21 = arith.addf %19, %20 : vector<1x128xf32>
    %22 = math.rsqrt %21 : vector<1x128xf32>
    %23 = arith.mulf %7, %22 : vector<1x128xf32>
    %24 = vector.broadcast %23 : vector<1x128xf32> to vector<8x128xf32>
    %25 = arith.mulf %14, %24 : vector<8x128xf32>
    %26 = vector.broadcast %8 : vector<1x128xf32> to vector<8x128xf32>
    %27 = arith.addf %25, %26 : vector<8x128xf32>
    %cst_12 = arith.constant 0.000000e+00 : f32
    %28 = vector.broadcast %cst_12 : f32 to vector<8x128xf32>
    %29 = arith.maximumf %27, %28 : vector<8x128xf32>
    %30 = arith.truncf %29 : vector<8x128xf32> to vector<8x128xbf16>
    %c0_13 = arith.constant 0 : index
    %c0_14 = arith.constant 0 : index
    %31 = vector.load %arg2[%c0_13, %c0_14] : memref<128x128xbf16, #tpu.memory_space<vmem>>, vector<128x128xbf16>
    %cst_15 = arith.constant dense<0.000000e+00> : vector<8x128xf32>
    %32 = tpu.matmul %30, %31, %cst_15 {dimension_numbers = #tpu.dot_dimension_numbers<[1], [0], [0], [1], [0, 0, 1, 1], [], []>} : vector<8x128xbf16>, vector<128x128xbf16>, vector<8x128xf32> -> vector<8x128xf32>
    %c1 = arith.constant 1 : index
    %c0_16 = arith.constant 0 : index
    %33 = vector.load %arg5[%c1, %c0_16] : memref<16x128xf32, #tpu.memory_space<vmem>>, vector<1x128xf32>
    %34 = vector.broadcast %33 : vector<1x128xf32> to vector<8x128xf32>
    %35 = arith.addf %32, %34 : vector<8x128xf32>
    %c5 = arith.constant 5 : index
    %c0_17 = arith.constant 0 : index
    %36 = vector.load %arg5[%c5, %c0_17] : memref<16x128xf32, #tpu.memory_space<vmem>>, vector<1x128xf32>
    %c8 = arith.constant 8 : index
    %c0_18 = arith.constant 0 : index
    %37 = vector.load %arg5[%c8, %c0_18] : memref<16x128xf32, #tpu.memory_space<vmem>>, vector<1x128xf32>
    %cst_19 = arith.constant dense<0.000000e+00> : vector<128xf32>
    %38 = vector.multi_reduction <add>, %35, %cst_19 [0] : vector<8x128xf32> to vector<128xf32>
    %39 = vector.shape_cast %38 : vector<128xf32> to vector<1x128xf32>
    %cst_20 = arith.constant 1.250000e-01 : f32
    %40 = vector.broadcast %cst_20 : f32 to vector<1x128xf32>
    %41 = arith.mulf %39, %40 : vector<1x128xf32>
    %42 = vector.broadcast %41 : vector<1x128xf32> to vector<8x128xf32>
    %43 = arith.subf %35, %42 : vector<8x128xf32>
    %44 = arith.mulf %43, %43 : vector<8x128xf32>
    %cst_21 = arith.constant dense<0.000000e+00> : vector<128xf32>
    %45 = vector.multi_reduction <add>, %44, %cst_21 [0] : vector<8x128xf32> to vector<128xf32>
    %46 = vector.shape_cast %45 : vector<128xf32> to vector<1x128xf32>
    %cst_22 = arith.constant 1.250000e-01 : f32
    %47 = vector.broadcast %cst_22 : f32 to vector<1x128xf32>
    %48 = arith.mulf %46, %47 : vector<1x128xf32>
    %cst_23 = arith.constant 9.99999974E-6 : f32
    %49 = vector.broadcast %cst_23 : f32 to vector<1x128xf32>
    %50 = arith.addf %48, %49 : vector<1x128xf32>
    %51 = math.rsqrt %50 : vector<1x128xf32>
    %52 = arith.mulf %36, %51 : vector<1x128xf32>
    %53 = vector.broadcast %52 : vector<1x128xf32> to vector<8x128xf32>
    %54 = arith.mulf %43, %53 : vector<8x128xf32>
    %55 = vector.broadcast %37 : vector<1x128xf32> to vector<8x128xf32>
    %56 = arith.addf %54, %55 : vector<8x128xf32>
    %cst_24 = arith.constant 0.000000e+00 : f32
    %57 = vector.broadcast %cst_24 : f32 to vector<8x128xf32>
    %58 = arith.maximumf %56, %57 : vector<8x128xf32>
    %59 = arith.truncf %58 : vector<8x128xf32> to vector<8x128xbf16>
    %c0_25 = arith.constant 0 : index
    %c0_26 = arith.constant 0 : index
    %60 = vector.load %arg3[%c0_25, %c0_26] : memref<128x128xbf16, #tpu.memory_space<vmem>>, vector<128x128xbf16>
    %cst_27 = arith.constant dense<0.000000e+00> : vector<8x128xf32>
    %61 = tpu.matmul %59, %60, %cst_27 {dimension_numbers = #tpu.dot_dimension_numbers<[1], [0], [0], [1], [0, 0, 1, 1], [], []>} : vector<8x128xbf16>, vector<128x128xbf16>, vector<8x128xf32> -> vector<8x128xf32>
    %c2 = arith.constant 2 : index
    %c0_28 = arith.constant 0 : index
    %62 = vector.load %arg5[%c2, %c0_28] : memref<16x128xf32, #tpu.memory_space<vmem>>, vector<1x128xf32>
    %63 = vector.broadcast %62 : vector<1x128xf32> to vector<8x128xf32>
    %64 = arith.addf %61, %63 : vector<8x128xf32>
    %c6 = arith.constant 6 : index
    %c0_29 = arith.constant 0 : index
    %65 = vector.load %arg5[%c6, %c0_29] : memref<16x128xf32, #tpu.memory_space<vmem>>, vector<1x128xf32>
    %c9 = arith.constant 9 : index
    %c0_30 = arith.constant 0 : index
    %66 = vector.load %arg5[%c9, %c0_30] : memref<16x128xf32, #tpu.memory_space<vmem>>, vector<1x128xf32>
    %cst_31 = arith.constant dense<0.000000e+00> : vector<128xf32>
    %67 = vector.multi_reduction <add>, %64, %cst_31 [0] : vector<8x128xf32> to vector<128xf32>
    %68 = vector.shape_cast %67 : vector<128xf32> to vector<1x128xf32>
    %cst_32 = arith.constant 1.250000e-01 : f32
    %69 = vector.broadcast %cst_32 : f32 to vector<1x128xf32>
    %70 = arith.mulf %68, %69 : vector<1x128xf32>
    %71 = vector.broadcast %70 : vector<1x128xf32> to vector<8x128xf32>
    %72 = arith.subf %64, %71 : vector<8x128xf32>
    %73 = arith.mulf %72, %72 : vector<8x128xf32>
    %cst_33 = arith.constant dense<0.000000e+00> : vector<128xf32>
    %74 = vector.multi_reduction <add>, %73, %cst_33 [0] : vector<8x128xf32> to vector<128xf32>
    %75 = vector.shape_cast %74 : vector<128xf32> to vector<1x128xf32>
    %cst_34 = arith.constant 1.250000e-01 : f32
    %76 = vector.broadcast %cst_34 : f32 to vector<1x128xf32>
    %77 = arith.mulf %75, %76 : vector<1x128xf32>
    %cst_35 = arith.constant 9.99999974E-6 : f32
    %78 = vector.broadcast %cst_35 : f32 to vector<1x128xf32>
    %79 = arith.addf %77, %78 : vector<1x128xf32>
    %80 = math.rsqrt %79 : vector<1x128xf32>
    %81 = arith.mulf %65, %80 : vector<1x128xf32>
    %82 = vector.broadcast %81 : vector<1x128xf32> to vector<8x128xf32>
    %83 = arith.mulf %72, %82 : vector<8x128xf32>
    %84 = vector.broadcast %66 : vector<1x128xf32> to vector<8x128xf32>
    %85 = arith.addf %83, %84 : vector<8x128xf32>
    %cst_36 = arith.constant 0.000000e+00 : f32
    %86 = vector.broadcast %cst_36 : f32 to vector<8x128xf32>
    %87 = arith.maximumf %85, %86 : vector<8x128xf32>
    %88 = arith.truncf %87 : vector<8x128xf32> to vector<8x128xbf16>
    %c0_37 = arith.constant 0 : index
    %c0_38 = arith.constant 0 : index
    %89 = vector.load %arg4[%c0_37, %c0_38] : memref<128x128xbf16, #tpu.memory_space<vmem>>, vector<128x128xbf16>
    %cst_39 = arith.constant dense<0.000000e+00> : vector<8x128xf32>
    %90 = tpu.matmul %88, %89, %cst_39 {dimension_numbers = #tpu.dot_dimension_numbers<[1], [0], [0], [1], [0, 0, 1, 1], [], []>} : vector<8x128xbf16>, vector<128x128xbf16>, vector<8x128xf32> -> vector<8x128xf32>
    %c3 = arith.constant 3 : index
    %c0_40 = arith.constant 0 : index
    %91 = vector.load %arg5[%c3, %c0_40] : memref<16x128xf32, #tpu.memory_space<vmem>>, vector<1x128xf32>
    %92 = vector.broadcast %91 : vector<1x128xf32> to vector<8x128xf32>
    %93 = arith.addf %90, %92 : vector<8x128xf32>
    %c0_41 = arith.constant 0 : index
    %c0_42 = arith.constant 0 : index
    %94 = vector.load %arg6[%c0_41, %c0_42] : memref<8x128xf32, #tpu.memory_space<vmem>>, vector<8x128xf32>
    tpu.vector_store %arg6[%c0_41, %c0_42], %93 {strides = array<i32>} : memref<8x128xf32, #tpu.memory_space<vmem>>, vector<8x128xf32>,
    return
  }
}

</mosaic_0001>

<bundles_post_ra>
// kernel: encoder_forward.1
= control target key start
LH: loop header
LB: loop body
LE: loop exit
PB: predicated region body
PF: predicated region fallthrough
CT: control target
= control target key end

     0   :  { %v795_v1 = vmov 0.0   ;;  %vm796_vm0 = vmmov 0   ;;  %s1010_s0 = inlined_call_operand.vmem [shape: f32[8,128], index: 0, kind: input, shape index: {}]   ;;  %s1011_s1 = inlined_call_operand.vmem [shape: bf16[128,128], index: 1, kind: input, shape index: {}]   ;;  %s1012_s2 = inlined_call_operand.vmem [shape: bf16[128,128], index: 2, kind: input, shape index: {}]   ;;  %s1013_s3 = inlined_call_operand.vmem [shape: bf16[128,128], index: 3, kind: input, shape index: {}]   ;;  %s1014_s4 = inlined_call_operand.vmem [shape: bf16[128,128], index: 4, kind: input, shape index: {}]   ;;  %s1015_s5 = inlined_call_operand.vmem [shape: f32[16,128], index: 5, kind: input, shape index: {}]   ;;  %s1016_s6 = inlined_call_operand.hbm [shape: f32[8,128], index: 6, kind: output, shape index: {}]  }
   0x1   :  { %v735_v0 = vld [vmem:[%s1011_s1 + $0x38] sm:$0xff]   ;;  %652 = vmatprep.subr.bf16.mxu0 %v795_v1  ;;  %672 = vmatprep.subr.bf16.mxu1 %v795_v1  ;;  %v736_v2 = vld [vmem:[%s1011_s1 + $0x30] sm:$0xff]   ;;  %v737_v3 = vld [vmem:[%s1011_s1 + $0x28] sm:$0xff]  }
   0x2   :  { %653 = vmatpush3.bf16.msra.mxu0 %v735_v0  ;;  %668 = vmatprep.mubr.msk.bf16.mxu0 %vm796_vm0, %v795_v1  ;;  %v738_v4 = vld [vmem:[%s1011_s1 + $0x20] sm:$0xff]   ;;  %v739_v5 = vld [vmem:[%s1011_s1 + $0x18] sm:$0xff]   ;;  %v740_v6 = vld [vmem:[%s1011_s1 + $0x10] sm:$0xff]  }
   0x3   :  { %654 = vmatprep.subr.bf16.mxu0 %v795_v1  ;;  %688 = vmatprep.mubr.msk.bf16.mxu1 %vm796_vm0, %v795_v1  ;;  %v741_v7 = vld [vmem:[%s1011_s1 + $0x8] sm:$0xff]  }
   0x6   :  { %655 = vmatpush3.bf16.msra.mxu0 %v736_v2 }
   0x7   :  { %656 = vmatprep.subr.bf16.mxu0 %v795_v1 }
   0xa   :  { %657 = vmatpush3.bf16.msra.mxu0 %v737_v3 }
   0xb   :  { %658 = vmatprep.subr.bf16.mxu0 %v795_v1 }
   0xe   :  { %659 = vmatpush3.bf16.msra.mxu0 %v738_v4 }
   0xf   :  { %660 = vmatprep.subr.bf16.mxu0 %v795_v1 }
  0x12   :  { %661 = vmatpush3.bf16.msra.mxu0 %v739_v5 }
  0x13   :  { %662 = vmatprep.subr.bf16.mxu0 %v795_v1 }
  0x16   :  { %663 = vmatpush3.bf16.msra.mxu0 %v740_v6 }
  0x17   :  { %664 = vmatprep.subr.bf16.mxu0 %v795_v1 }
  0x18   :  { %11 = vsyncpa [#allocation3], 0  ;;  %v742_v8 = vld [vmem:[%s1011_s1] sm:$0xff]   ;;  %v743_v11 = vld [vmem:[%s1012_s2 + $0x38] sm:$0xff]   ;;  %v157_v42 = vlaneseq  ;;  %s797_s25 = smov [#allocation2]  }
  0x19   :  { %v25_v9 = vld [vmem:[%s1010_s0] sm:$0xff]  ;;  %673 = vmatpush3.bf16.msra.mxu1 %v743_v11  ;;  %v744_v12 = vld [vmem:[%s1012_s2 + $0x30] sm:$0xff]   ;;  %v745_v13 = vld [vmem:[%s1012_s2 + $0x28] sm:$0xff]  }
  0x1a   :  { %665 = vmatpush3.bf16.msra.mxu0 %v741_v7  ;;  %v26_v10 = vpack.c.bf16 %v25_v9, %v25_v9  ;;  %674 = vmatprep.subr.bf16.mxu1 %v795_v1  ;;  %v746_v14 = vld [vmem:[%s1012_s2 + $0x20] sm:$0xff]   ;;  %v747_v15 = vld [vmem:[%s1012_s2 + $0x18] sm:$0xff]   ;;  %v748_v16 = vld [vmem:[%s1012_s2 + $0x10] sm:$0xff]   ;;  %v158_v43 = vshrl.u32 %v157_v42, 7 }
  0x1b   :  { %666 = vmatprep.subr.bf16.mxu0 %v795_v1  ;;  %v749_v17 = vld [vmem:[%s1012_s2 + $0x8] sm:$0xff]   ;;  %v750_v18 = vld [vmem:[%s1012_s2] sm:$0xff]   ;;  %v751_v54 = vld [vmem:[%s1013_s3 + $0x38] sm:$0xff]  }
  0x1c   :  { %v577_v19 = vld [vmem:[%s1015_s5] ss:$0 sm:$0xff]  ;;  %v136_v44 = vld [vmem:[%s1015_s5 + $0x4] sm:$0x1]  ;;  %v914_v45 = vsub.s32 0, %v158_v43  ;;  %v752_v55 = vld [vmem:[%s1013_s3 + $0x30] sm:$0xff]  }
  0x1d   :  { %675 = vmatpush3.bf16.msra.mxu1 %v744_v12  ;;  %v586_v49 = vld [vmem:[%s1015_s5 + $0x7] ss:$0 sm:$0xff]  ;;  %v753_v56 = vld [vmem:[%s1013_s3 + $0x28] sm:$0xff]   ;;  %v755_v58 = vld [vmem:[%s1013_s3 + $0x18] sm:$0xff]  }
  0x1e   :  { %667 = vmatpush3.bf16.msra.mxu0 %v742_v8  ;;  %676 = vmatprep.subr.bf16.mxu1 %v795_v1  ;;  %v754_v57 = vld [vmem:[%s1013_s3 + $0x20] sm:$0xff]   ;;  %v756_v59 = vld [vmem:[%s1013_s3 + $0x10] sm:$0xff]   ;;  %v757_v60 = vld [vmem:[%s1013_s3 + $0x8] sm:$0xff]  }
  0x1f   :  { %692 = vmatprep.subr.bf16.mxu0 %v795_v1  ;;  %v758_v61 = vld [vmem:[%s1013_s3] sm:$0xff]   ;;  %s569_s3 = sshll.u32 %s797_s25, 4  ;;  %s570_s3 = int_to_ptr.vmem [resolvable:$true] %s569_s3 }
  0x20   :  { %v587_v62 = vld [vmem:[%s1015_s5 + $0x1] ss:$0 sm:$0xff]  ;;  %s773_s26 = scalar_lea.vmem %s570_s3, 128  ;;  %p778_p1 = scmp.lt.s32.totalorder %s570_s3, %s570_s3 }
  0x21   :  { %669 = vmatmul.mubr.bf16.vlgmr.msra.gmra.mxu0 %v26_v10  ;;  %677 = vmatpush3.bf16.msra.mxu1 %v745_v13  ;;  %p774_p0 = scmp.ne.s32.totalorder %s570_s3, %s773_s26  ;;  %p779_p2 = scmp.lt.s32.totalorder %s773_s26, %s773_s26 }
  0x22   :  { %708 = vmatprep.mubr.msk.bf16.mxu0 %vm796_vm0, %v795_v1  ;;  %678 = vmatprep.subr.bf16.mxu1 %v795_v1 }
  0x23   :  { %693 = vmatpush3.bf16.msra.mxu0 %v751_v54  ;;  %p780_p3 = por %p779_p2, %p778_p1 }
  0x24   :  { %694 = vmatprep.subr.bf16.mxu0 %v795_v1 }
  0x25   :  { %679 = vmatpush3.bf16.msra.mxu1 %v746_v14  ;;  %p781_p4 = pnand %p780_p3, %p774_p0 }
  0x26   :  { %680 = vmatprep.subr.bf16.mxu1 %v795_v1 }
  0x27   :  { %695 = vmatpush3.bf16.msra.mxu0 %v752_v55 }
  0x28   :  { %696 = vmatprep.subr.bf16.mxu0 %v795_v1 }
  0x29   :  { %681 = vmatpush3.bf16.msra.mxu1 %v747_v15 }
  0x2a   :  { %682 = vmatprep.subr.bf16.mxu1 %v795_v1 }
  0x2b   :  { %697 = vmatpush3.bf16.msra.mxu0 %v753_v56 }
  0x2c   :  { %698 = vmatprep.subr.bf16.mxu0 %v795_v1 }
  0x2d   :  { %683 = vmatpush3.bf16.msra.mxu1 %v748_v16 }
  0x2e   :  { %684 = vmatprep.subr.bf16.mxu1 %v795_v1 }
  0x2f   :  { %699 = vmatpush3.bf16.msra.mxu0 %v754_v57 }
  0x30   :  { %700 = vmatprep.subr.bf16.mxu0 %v795_v1 }
  0x31   :  { %685 = vmatpush3.bf16.msra.mxu1 %v749_v17 }
  0x32   :  { %686 = vmatprep.subr.bf16.mxu1 %v795_v1 }
  0x33   :  { %701 = vmatpush3.bf16.msra.mxu0 %v755_v58 }
  0x34   :  { %702 = vmatprep.subr.bf16.mxu0 %v795_v1 }
  0x35   :  { %687 = vmatpush3.bf16.msra.mxu1 %v750_v18 }
  0x36   :  { %712 = vmatprep.subr.bf16.mxu1 %v795_v1 }
  0x37   :  { %703 = vmatpush3.bf16.msra.mxu0 %v756_v59 }
  0x38   :  { %704 = vmatprep.subr.bf16.mxu0 %v795_v1 }
  0x3b   :  { %705 = vmatpush3.bf16.msra.mxu0 %v757_v60 }
  0x3c   :  { %706 = vmatprep.subr.bf16.mxu0 %v795_v1 }
  0x3f   :  { %707 = vmatpush3.bf16.msra.mxu0 %v758_v61 }
  0xe1   :  { %v130_v20 = vpop.f32.mrf.mxu0 }
  0xe2   :  { %v131_v21 = vadd.f32 %v577_v19, %v130_v20 }
  0xe3   :  { %v670_v22 = vpop.f32.mrf.mxu0 }
  0xe4   :  { %v138_v23 = vrot.slane %v131_v21, 4  ;;  %v278_v22 = vld [vmem:[%s1015_s5 + $0x5] sm:$0x1] }
  0xe5   :  { %v133_v24 = vpop.f32.mrf.mxu0 }
  0xe6   :  { %v139_v25 = vadd.f32 %v138_v23, %v131_v21 }
  0xe7   :  { %v671_v26 = vpop.f32.mrf.mxu0 }
  0xe8   :  { %v140_v27 = vrot.slane %v139_v25, 2  ;;  %v596_v26 = vld [vmem:[%s1015_s5 + $0x8] ss:$0 sm:$0xff] }
  0xea   :  { %v141_v28 = vadd.f32 %v140_v27, %v139_v25 }
  0xec   :  { %v142_v29 = vrot.slane %v141_v28, 1 }
  0xee   :  { %v143_v30 = vadd.f32 %v142_v29, %v141_v28 }
  0xf0   :  { %v144_v31 = vmul.f32 0.125, %v143_v30 }
  0xf2   :  { %v145_v32 = vsub.f32 %v131_v21, %v144_v31  ;;  %v759_v31 = vld [vmem:[%s1014_s4 + $0x38] sm:$0xff]  }
  0xf4   :  { %v146_v33 = vmul.f32 %v145_v32, %v145_v32 }
  0xf6   :  { %v147_v34 = vrot.slane %v146_v33, 4 }
  0xf8   :  { %v148_v35 = vadd.f32 %v147_v34, %v146_v33  ;;  %v761_v33 = vld [vmem:[%s1014_s4 + $0x28] sm:$0xff]   ;;  %v762_v34 = vld [vmem:[%s1014_s4 + $0x20] sm:$0xff]  }
  0xfa   :  { %v149_v36 = vrot.slane %v148_v35, 2 }
  0xfc   :  { %v150_v37 = vadd.f32 %v149_v36, %v148_v35  ;;  %v763_v35 = vld [vmem:[%s1014_s4 + $0x18] sm:$0xff]   ;;  %v764_v36 = vld [vmem:[%s1014_s4 + $0x10] sm:$0xff]  }
  0xfe   :  { %v151_v38 = vrot.slane %v150_v37, 1 }
 0x100   :  { %v152_v39 = vadd.f32 %v151_v38, %v150_v37  ;;  %v765_v37 = vld [vmem:[%s1014_s4 + $0x8] sm:$0xff]   ;;  %v766_v38 = vld [vmem:[%s1014_s4] sm:$0xff]  }
 0x102   :  { %v153_v40 = vmul.f32 0.125, %v152_v39  ;;  %v597_v39 = vld [vmem:[%s1015_s5 + $0x2] ss:$0 sm:$0xff] }
 0x104   :  { %v154_v41 = vadd.f32 1e-05, %v153_v40 }
 0x106   :  { %767 = vrsqrt.f32 %v154_v41 }
 0x113   :  { %v768_v46 = vpop.eup %767 }
 0x114   :  { %v156_v47 = vmul.f32 %v768_v46, %v136_v44 }
 0x116   :  { %v160_v48 = vrot.slane %v156_v47, %v914_v45 }
 0x118   :  { %v161_v50 = vmul.f32 %v160_v48, %v145_v32  ;;  %v760_v32 = vld [vmem:[%s1014_s4 + $0x30] sm:$0xff]  }
 0x11a   :  { %v166_v51 = vadd.f32 %v586_v49, %v161_v50 }
 0x11c   :  { %v167_v52 = vmax.f32 %v166_v51, 0.0 }
 0x11e   :  { %v168_v53 = vpack.c.bf16 %v167_v52, %v167_v52 }
 0x120   :  { %689 = vmatmul.mubr.bf16.vlgmr.msra.gmra.mxu1 %v168_v53 }
 0x121   :  { %728 = vmatprep.mubr.msk.bf16.mxu1 %vm796_vm0, %v795_v1  ;;  %713 = vmatpush3.bf16.msra.mxu1 %v759_v31 }
 0x122   :  { %714 = vmatprep.subr.bf16.mxu1 %v795_v1 }
 0x125   :  { %715 = vmatpush3.bf16.msra.mxu1 %v760_v32 }
 0x126   :  { %716 = vmatprep.subr.bf16.mxu1 %v795_v1 }
 0x129   :  { %717 = vmatpush3.bf16.msra.mxu1 %v761_v33 }
 0x12a   :  { %718 = vmatprep.subr.bf16.mxu1 %v795_v1 }
 0x12d   :  { %719 = vmatpush3.bf16.msra.mxu1 %v762_v34 }
 0x12e   :  { %720 = vmatprep.subr.bf16.mxu1 %v795_v1 }
 0x131   :  { %721 = vmatpush3.bf16.msra.mxu1 %v763_v35 }
 0x132   :  { %722 = vmatprep.subr.bf16.mxu1 %v795_v1 }
 0x135   :  { %723 = vmatpush3.bf16.msra.mxu1 %v764_v36 }
 0x136   :  { %724 = vmatprep.subr.bf16.mxu1 %v795_v1 }
 0x139   :  { %725 = vmatpush3.bf16.msra.mxu1 %v765_v37 }
 0x13a   :  { %726 = vmatprep.subr.bf16.mxu1 %v795_v1 }
 0x13d   :  { %727 = vmatpush3.bf16.msra.mxu1 %v766_v38 }
 0x1e0   :  { %v272_v63 = vpop.f32.mrf.mxu1 }
 0x1e1   :  { %v273_v0 = vadd.f32 %v587_v62, %v272_v63  ;;  %v420_v62 = vld [vmem:[%s1015_s5 + $0x6] sm:$0x1] }
 0x1e2   :  { %v690_v2 = vpop.f32.mrf.mxu1 }
 0x1e3   :  { %v280_v3 = vrot.slane %v273_v0, 4 }
 0x1e4   :  { %v275_v4 = vpop.f32.mrf.mxu1 }
 0x1e5   :  { %v281_v5 = vadd.f32 %v280_v3, %v273_v0  ;;  %v606_v3 = vld [vmem:[%s1015_s5 + $0x9] ss:$0 sm:$0xff] }
 0x1e6   :  { %v691_v6 = vpop.f32.mrf.mxu1 }
 0x1e7   :  { %v282_v7 = vrot.slane %v281_v5, 2 }
 0x1e9   :  { %v283_v8 = vadd.f32 %v282_v7, %v281_v5 }
 0x1eb   :  { %v284_v9 = vrot.slane %v283_v8, 1 }
 0x1ed   :  { %v285_v10 = vadd.f32 %v284_v9, %v283_v8  ;;  %v607_v8 = vld [vmem:[%s1015_s5 + $0x3] ss:$0 sm:$0xff] }
 0x1ef   :  { %v286_v11 = vmul.f32 0.125, %v285_v10 }
 0x1f1   :  { %v287_v12 = vsub.f32 %v273_v0, %v286_v11 }
 0x1f3   :  { %v288_v13 = vmul.f32 %v287_v12, %v287_v12 }
 0x1f5   :  { %v289_v14 = vrot.slane %v288_v13, 4 }
 0x1f7   :  { %v290_v15 = vadd.f32 %v289_v14, %v288_v13 }
 0x1f9   :  { %v291_v16 = vrot.slane %v290_v15, 2 }
 0x1fb   :  { %v292_v17 = vadd.f32 %v291_v16, %v290_v15 }
 0x1fd   :  { %v293_v18 = vrot.slane %v292_v17, 1 }
 0x1ff   :  { %v294_v19 = vadd.f32 %v293_v18, %v292_v17 }
 0x201   :  { %v295_v20 = vmul.f32 0.125, %v294_v19 }
 0x203   :  { %v296_v21 = vadd.f32 1e-05, %v295_v20 }
 0x205   :  { %769 = vrsqrt.f32 %v296_v21 }
 0x212   :  { %v770_v23 = vpop.eup %769 }
 0x213   :  { %v298_v24 = vmul.f32 %v770_v23, %v278_v22 }
 0x215   :  { %v302_v25 = vrot.slane %v298_v24, %v914_v45 }
 0x217   :  { %v303_v27 = vmul.f32 %v302_v25, %v287_v12 }
 0x219   :  { %v308_v28 = vadd.f32 %v596_v26, %v303_v27 }
 0x21b   :  { %v309_v29 = vmax.f32 %v308_v28, 0.0 }
 0x21d   :  { %v310_v30 = vpack.c.bf16 %v309_v29, %v309_v29 }
 0x21f   :  { %709 = vmatmul.mubr.bf16.vlgmr.msra.gmra.mxu0 %v310_v30 }
 0x2df   :  { %v414_v40 = vpop.f32.mrf.mxu0 }
 0x2e0   :  { %v415_v41 = vadd.f32 %v597_v39, %v414_v40 }
 0x2e1   :  { %v710_v42 = vpop.f32.mrf.mxu0 }
 0x2e2   :  { %v422_v43 = vrot.slane %v415_v41, 4 }
 0x2e3   :  { %v417_v44 = vpop.f32.mrf.mxu0 }
 0x2e4   :  { %v423_v46 = vadd.f32 %v422_v43, %v415_v41 }
 0x2e5   :  { %v711_v47 = vpop.f32.mrf.mxu0 }
 0x2e6   :  { %v424_v48 = vrot.slane %v423_v46, 2 }
 0x2e8   :  { %v425_v49 = vadd.f32 %v424_v48, %v423_v46 }
 0x2ea   :  { %v426_v50 = vrot.slane %v425_v49, 1 }
 0x2ec   :  { %v427_v51 = vadd.f32 %v426_v50, %v425_v49 }
 0x2ee   :  { %v428_v52 = vmul.f32 0.125, %v427_v51 }
 0x2f0   :  { %v429_v53 = vsub.f32 %v415_v41, %v428_v52 }
 0x2f2   :  { %v430_v54 = vmul.f32 %v429_v53, %v429_v53 }
 0x2f4   :  { %v431_v1 = vrot.slane %v430_v54, 4 }
 0x2f6   :  { %v432_v55 = vadd.f32 %v431_v1, %v430_v54 }
 0x2f8   :  { %v433_v56 = vrot.slane %v432_v55, 2 }
 0x2fa   :  { %v434_v57 = vadd.f32 %v433_v56, %v432_v55 }
 0x2fc   :  { %v435_v58 = vrot.slane %v434_v57, 1 }
 0x2fe   :  { %v436_v59 = vadd.f32 %v435_v58, %v434_v57 }
 0x300   :  { %v437_v60 = vmul.f32 0.125, %v436_v59 }
 0x302   :  { %v438_v61 = vadd.f32 1e-05, %v437_v60 }
 0x304   :  { %771 = vrsqrt.f32 %v438_v61 }
 0x311   :  { %v772_v63 = vpop.eup %771 }
 0x312   :  { %v440_v0 = vmul.f32 %v772_v63, %v420_v62 }
 0x314   :  { %v444_v2 = vrot.slane %v440_v0, %v914_v45 }
 0x316   :  { %v445_v4 = vmul.f32 %v444_v2, %v429_v53 }
 0x318   :  { %v450_v5 = vadd.f32 %v606_v3, %v445_v4 }
 0x31a   :  { %v451_v6 = vmax.f32 %v450_v5, 0.0 }
 0x31c   :  { %v452_v7 = vpack.c.bf16 %v451_v6, %v451_v6 }
 0x31e   :  { %729 = vmatmul.mubr.bf16.vlgmr.msra.gmra.mxu1 %v452_v7 }
 0x3de   :  { %v556_v9 = vpop.f32.mrf.mxu1 }
 0x3df   :  { %v557_v10 = vadd.f32 %v607_v8, %v556_v9 }
 0x3e0   :  { %v730_v11 = vpop.f32.mrf.mxu1 }
 0x3e1   :  { %562 = vst [vmem:[#allocation2] sm:$0xff] %v557_v10 }
 0x3e2   :  { %v559_v45 = vpop.f32.mrf.mxu1 }
 0x3e3   :  { %784 = shalt.err (!%p781_p4)
}
 0x3e4   :  { %572 = dma.vmem_to_hbm [thread:$0]  %s570_s3, 128, %s1016_s6, [#allocation3]   ;;  %v731_v12 = vpop.f32.mrf.mxu1 }
 0x3e5   :  { %793 = dma.done.wait [#allocation3], 128  }
 0x3e6   :  { %794 = vsyncadd [#allocation3], 4294967168 }
 0x3e7   :  { %576 = vsyncpa [#allocation3], 1 }

</bundles_post_ra>
